<compile_context>
chip_gen: v7x
topology: tpu7x:2x2x1
jax: 0.10.0
libtpu: 0.0.40
codegen_flags: <defaults>
</compile_context>

<pallas_src>
import functools

import jax
import jax.numpy as jnp
from jax import lax
from jax.experimental import pallas as pl
from jax.experimental.pallas import tpu as pltpu

HIDDEN1 = 128
HIDDEN2 = 64
HIDDEN2_PAD = 128          # pad hidden2 64 -> 128 so h2 vregs are lane-dense (VMEM only)
DEFAULT_BATCH_TILE = 4096  # safe for v5e's 16 MiB scoped-VMEM default


def _round_up(a: int, m: int) -> int:
    return ((a + m - 1) // m) * m


def mlp_kernel(x_ref, w1_ref, b1_ref, w2_ref, b2_ref, w3_ref, b3_ref, o_ref, *, chunk):
    """Fused 3-layer MLP: 3 bf16 MXU matmuls (f32 accumulation) + f32 bias/ReLU.

    Processes the (tb, in) batch tile in `chunk`-row sub-chunks so the f32
    intermediates never materialize as full (tb, 128) VMEM buffers.
    """
    w1 = w1_ref[...]                 # bf16 [in, 128]
    b1 = b1_ref[...]                 # f32  [1, 128]
    w2 = w2_ref[...]                 # bf16 [128, 128] (cols 64.. are zero)
    b2 = b2_ref[...]                 # f32  [1, 128]   (cols 64.. are zero)
    w3 = w3_ref[...]                 # bf16 [128, nq]  (rows 64.. are zero)
    b3 = b3_ref[...]                 # f32  [1, nq]

    n_chunks = x_ref.shape[0] // chunk

    def body(c, carry):
        start = pl.multiple_of(c * chunk, chunk)
        x = x_ref[pl.ds(start, chunk), :].astype(jnp.bfloat16)      # cast in VMEM
        h1 = jnp.dot(x, w1, preferred_element_type=jnp.float32) + b1
        h1 = jnp.maximum(h1, 0.0)
        h2 = jnp.dot(h1.astype(jnp.bfloat16), w2,
                     preferred_element_type=jnp.float32) + b2
        h2 = jnp.maximum(h2, 0.0)
        out = jnp.dot(h2.astype(jnp.bfloat16), w3,
                      preferred_element_type=jnp.float32) + b3
        o_ref[pl.ds(start, chunk), :] = out.astype(o_ref.dtype)
        return carry

    lax.fori_loop(0, n_chunks, body, 0, unroll=True)


def _pad_params(params):
    """Zero-pad hidden2 (64->128) in VMEM-facing weights; cast weights to bf16."""
    w1 = params["w1"].astype(jnp.bfloat16)                          # [in, 128]
    b1 = params["b1"].astype(jnp.float32)                           # [1, 128]

    w2 = params["w2"]                                               # [128, 64]
    b2 = params["b2"]                                               # [1, 64]
    w3 = params["w3"]                                               # [64, nq]
    b3 = params["b3"].astype(jnp.float32)                           # [1, nq]

    # pad hidden2 columns of w2/b2 with zeros -> ReLU(0) = 0 in the padded lanes
    w2p = jnp.pad(w2, ((0, 0), (0, HIDDEN2_PAD - HIDDEN2))).astype(jnp.bfloat16)
    b2p = jnp.pad(b2, ((0, 0), (0, HIDDEN2_PAD - HIDDEN2))).astype(jnp.float32)
    # pad w3 rows only (K dim); padded h2 lanes are exactly zero so no output error.
    w3p = jnp.pad(w3, ((0, HIDDEN2_PAD - HIDDEN2), (0, 0))).astype(jnp.bfloat16)
    return w1, b1, w2p, b2p, w3p, b3


def _choose_tile(B, batch_tile):
    if batch_tile is not None:
        return max(8, _round_up(int(batch_tile), 8))     # defensive: multiple of 8
    if B <= 512:
        return _round_up(B, 8)                           # tiny problem, one step is fine
    # >= 2 grid steps so v7x megacore shards across both TCs; multiple of 256 so
    # the in-kernel chunking stays active; cap step size for v5e scoped VMEM.
    return min(DEFAULT_BATCH_TILE, _round_up(pl.cdiv(B, 2), 256))


def _choose_chunk(tb):
    for c in (256, 128):
        if tb % c == 0:
            return c
    return tb


@functools.partial(jax.jit, static_argnames=("batch_tile",))
def neural_network_forward(x, params, *, batch_tile=None):
    """Run the fused MLP Pallas kernel.

    x: [B, input_size] float32
    params: dict with w1 [in,128], b1 [1,128], w2 [128,64], b2 [1,64],
            w3 [64,nq], b3 [1,nq]
    Returns [B, nq] float32.
    """
    B, in_size = x.shape
    nq = params["w3"].shape[1]

    tb = _choose_tile(B, batch_tile)
    chunk = _choose_chunk(tb)
    grid = (pl.cdiv(B, tb),)        # Pallas pads the ragged last block, clips its store

    w1, b1, w2, b2, w3, b3 = _pad_params(params)

    # Batch axis is tiled; all weights/biases are replicated to every grid step.
    in_specs = [
        pl.BlockSpec((tb, in_size), lambda i: (i, 0)),              # x (f32, cast in kernel)
        pl.BlockSpec((in_size, HIDDEN1), lambda i: (0, 0)),         # w1
        pl.BlockSpec((1, HIDDEN1), lambda i: (0, 0)),               # b1
        pl.BlockSpec((HIDDEN1, HIDDEN2_PAD), lambda i: (0, 0)),     # w2 (K/N padded)
        pl.BlockSpec((1, HIDDEN2_PAD), lambda i: (0, 0)),           # b2 (padded)
        pl.BlockSpec((HIDDEN2_PAD, nq), lambda i: (0, 0)),          # w3 (K padded only)
        pl.BlockSpec((1, nq), lambda i: (0, 0)),                    # b3 (unpadded)
    ]
    out_spec = pl.BlockSpec((tb, nq), lambda i: (i, 0))             # un-padded output

    flops = 2 * B * (in_size * HIDDEN1 + HIDDEN1 * HIDDEN2_PAD + HIDDEN2_PAD * nq)
    bytes_accessed = (
        x.size * 4 + B * nq * 4
        + w1.size * 2 + w2.size * 2 + w3.size * 2
        + b1.size * 4 + b2.size * 4 + b3.size * 4
    )

    out = pl.pallas_call(
        functools.partial(mlp_kernel, chunk=chunk),
        out_shape=jax.ShapeDtypeStruct((B, nq), jnp.float32),
        grid_spec=pltpu.PrefetchScalarGridSpec(
            num_scalar_prefetch=0,
            grid=grid,
            in_specs=in_specs,
            out_specs=out_spec,
        ),
        compiler_params=pltpu.CompilerParams(
            dimension_semantics=("parallel",),
        ),
        cost_estimate=pl.CostEstimate(
            flops=flops, transcendentals=0, bytes_accessed=bytes_accessed),
    )(x, w1, b1, w2, b2, w3, b3)

    return out


def init_params(key, input_size, n_quantiles):
    """Deterministic parameter init (uniform, like torch's default Linear init)."""
    ks = jax.random.split(key, 6)

    def lin(kw, kb, fan_in, fan_out):
        bound = 1.0 / jnp.sqrt(fan_in)
        w = jax.random.uniform(kw, (fan_in, fan_out), jnp.float32, -bound, bound)
        b = jax.random.uniform(kb, (1, fan_out), jnp.float32, -bound, bound)
        return w, b

    w1, b1 = lin(ks[0], ks[1], input_size, HIDDEN1)
    w2, b2 = lin(ks[2], ks[3], HIDDEN1, HIDDEN2)
    w3, b3 = lin(ks[4], ks[5], HIDDEN2, n_quantiles)
    return {"w1": w1, "b1": b1, "w2": w2, "b2": b2, "w3": w3, "b3": b3}


def reference_forward(x, p):
    h1 = jnp.maximum(x @ p["w1"] + p["b1"], 0.0)
    h2 = jnp.maximum(h1 @ p["w2"] + p["b2"], 0.0)
    return h2 @ p["w3"] + p["b3"]


if __name__ == "__main__":
    key = jax.random.PRNGKey(0)
    k_x, k_p = jax.random.split(key)

    batch = 8
    input_size = 32
    n_quantiles = 8

    x = jax.random.normal(k_x, (batch, input_size), jnp.float32)
    params = init_params(k_p, input_size, n_quantiles)

    out = neural_network_forward(x, params)
    out = jax.block_until_ready(out)

    ref = reference_forward(x, params)
    assert out.shape == (batch, n_quantiles)
    # bf16 matmul operands (f32 accumulation) -> loosened tolerance vs f32 reference
    assert jnp.allclose(out, ref, atol=3e-2, rtol=3e-2), (
        float(jnp.max(jnp.abs(out - ref))))

    # Multi-step grid with a ragged (partial) last block: 300 rows, tile 128.
    batch2 = 300
    x2 = jax.random.normal(k_x, (batch2, input_size), jnp.float32)
    out2 = jax.block_until_ready(neural_network_forward(x2, params, batch_tile=128))
    ref2 = reference_forward(x2, params)
    assert out2.shape == (batch2, n_quantiles)
    assert jnp.allclose(out2, ref2, atol=3e-2, rtol=3e-2)

    # Large-batch path: auto tile selection (>=2 parallel steps, in-kernel chunking).
    batch3 = 3000
    x3 = jax.random.normal(k_x, (batch3, input_size), jnp.float32)
    out3 = jax.block_until_ready(neural_network_forward(x3, params))
    ref3 = reference_forward(x3, params)
    assert out3.shape == (batch3, n_quantiles)
    assert jnp.allclose(out3, ref3, atol=3e-2, rtol=3e-2)

    print("KERNEL_OK")
</pallas_src>

<mosaic_0001>
module attributes {stable_mosaic.version = 11 : i64} {
  func.func @mlp_kernel(%arg0: i32, %arg1: memref<8x32xf32, #tpu.memory_space<vmem>>, %arg2: memref<32x128xbf16, #tpu.memory_space<vmem>>, %arg3: memref<1x128xf32, #tpu.memory_space<vmem>>, %arg4: memref<128x128xbf16, #tpu.memory_space<vmem>>, %arg5: memref<1x128xf32, #tpu.memory_space<vmem>>, %arg6: memref<128x8xbf16, #tpu.memory_space<vmem>>, %arg7: memref<1x8xf32, #tpu.memory_space<vmem>>, %arg8: memref<8x8xf32, #tpu.memory_space<vmem>>) attributes {dimension_semantics = [#tpu.dimension_semantics<parallel>], iteration_bounds = array<i64: 1>, scalar_prefetch = 0 : i64, scratch_operands = 0 : i64, tpu.core_type = #tpu.core_type<tc>, window_params = [{transform_indices = @transform_0, window_bounds = array<i64: 8, 32>}, {pipeline_mode = #tpu.pipeline_mode<synchronous>, transform_indices = @transform_1, window_bounds = array<i64: 32, 128>}, {pipeline_mode = #tpu.pipeline_mode<synchronous>, transform_indices = @transform_2, window_bounds = array<i64: 1, 128>}, {pipeline_mode = #tpu.pipeline_mode<synchronous>, transform_indices = @transform_3, window_bounds = array<i64: 128, 128>}, {pipeline_mode = #tpu.pipeline_mode<synchronous>, transform_indices = @transform_4, window_bounds = array<i64: 1, 128>}, {pipeline_mode = #tpu.pipeline_mode<synchronous>, transform_indices = @transform_5, window_bounds = array<i64: 128, 8>}, {pipeline_mode = #tpu.pipeline_mode<synchronous>, transform_indices = @transform_6, window_bounds = array<i64: 1, 8>}, {transform_indices = @transform_7, window_bounds = array<i64: 8, 8>}]} {
    %c0 = arith.constant 0 : index
    %c0_0 = arith.constant 0 : index
    %0 = vector.load %arg2[%c0, %c0_0] : memref<32x128xbf16, #tpu.memory_space<vmem>>, vector<32x128xbf16>
    %c0_1 = arith.constant 0 : index
    %c0_2 = arith.constant 0 : index
    %1 = vector.load %arg3[%c0_1, %c0_2] : memref<1x128xf32, #tpu.memory_space<vmem>>, vector<1x128xf32>
    %c0_3 = arith.constant 0 : index
    %c0_4 = arith.constant 0 : index
    %2 = vector.load %arg4[%c0_3, %c0_4] : memref<128x128xbf16, #tpu.memory_space<vmem>>, vector<128x128xbf16>
    %c0_5 = arith.constant 0 : index
    %c0_6 = arith.constant 0 : index
    %3 = vector.load %arg5[%c0_5, %c0_6] : memref<1x128xf32, #tpu.memory_space<vmem>>, vector<1x128xf32>
    %c0_7 = arith.constant 0 : index
    %c0_8 = arith.constant 0 : index
    %4 = vector.load %arg6[%c0_7, %c0_8] : memref<128x8xbf16, #tpu.memory_space<vmem>>, vector<128x8xbf16>
    %c0_9 = arith.constant 0 : index
    %c0_10 = arith.constant 0 : index
    %5 = vector.load %arg7[%c0_9, %c0_10] : memref<1x8xf32, #tpu.memory_space<vmem>>, vector<1x8xf32>
    %c0_i32 = arith.constant 0 : i32
    %c8_i32 = arith.constant 8 : i32
    %6 = arith.muli %c0_i32, %c8_i32 : i32
    %7 = tpu.assume_multiple %6, 8 : i32
    %8 = arith.index_cast %7 : i32 to index
    %c0_11 = arith.constant 0 : index
    %9 = vector.load %arg1[%8, %c0_11] : memref<8x32xf32, #tpu.memory_space<vmem>>, vector<8x32xf32>
    %10 = arith.truncf %9 : vector<8x32xf32> to vector<8x32xbf16>
    %cst = arith.constant dense<0.000000e+00> : vector<8x128xf32>
    %11 = tpu.matmul %10, %0, %cst {dimension_numbers = #tpu.dot_dimension_numbers<[1], [0], [0], [1], [0, 0, 1, 1], [], []>} : vector<8x32xbf16>, vector<32x128xbf16>, vector<8x128xf32> -> vector<8x128xf32>
    %12 = vector.broadcast %1 : vector<1x128xf32> to vector<8x128xf32>
    %13 = arith.addf %11, %12 : vector<8x128xf32>
    %cst_12 = arith.constant 0.000000e+00 : f32
    %14 = vector.broadcast %cst_12 : f32 to vector<8x128xf32>
    %15 = arith.maximumf %13, %14 : vector<8x128xf32>
    %16 = arith.truncf %15 : vector<8x128xf32> to vector<8x128xbf16>
    %cst_13 = arith.constant dense<0.000000e+00> : vector<8x128xf32>
    %17 = tpu.matmul %16, %2, %cst_13 {dimension_numbers = #tpu.dot_dimension_numbers<[1], [0], [0], [1], [0, 0, 1, 1], [], []>} : vector<8x128xbf16>, vector<128x128xbf16>, vector<8x128xf32> -> vector<8x128xf32>
    %18 = vector.broadcast %3 : vector<1x128xf32> to vector<8x128xf32>
    %19 = arith.addf %17, %18 : vector<8x128xf32>
    %cst_14 = arith.constant 0.000000e+00 : f32
    %20 = vector.broadcast %cst_14 : f32 to vector<8x128xf32>
    %21 = arith.maximumf %19, %20 : vector<8x128xf32>
    %22 = arith.truncf %21 : vector<8x128xf32> to vector<8x128xbf16>
    %cst_15 = arith.constant dense<0.000000e+00> : vector<8x8xf32>
    %23 = tpu.matmul %22, %4, %cst_15 {dimension_numbers = #tpu.dot_dimension_numbers<[1], [0], [0], [1], [0, 0, 1, 1], [], []>} : vector<8x128xbf16>, vector<128x8xbf16>, vector<8x8xf32> -> vector<8x8xf32>
    %24 = vector.broadcast %5 : vector<1x8xf32> to vector<8x8xf32>
    %25 = arith.addf %23, %24 : vector<8x8xf32>
    %26 = arith.index_cast %7 : i32 to index
    %c0_16 = arith.constant 0 : index
    %27 = vector.load %arg8[%26, %c0_16] : memref<8x8xf32, #tpu.memory_space<vmem>>, vector<8x8xf32>
    tpu.vector_store %arg8[%26, %c0_16], %25 {strides = array<i32>} : memref<8x8xf32, #tpu.memory_space<vmem>>, vector<8x8xf32>,
    %c1_i32 = arith.constant 1 : i32
    return
  }
  func.func @transform_0(%arg0: i32) -> (i32, i32) {
    %c0_i32 = arith.constant 0 : i32
    %c0_i32_0 = arith.constant 0 : i32
    return %arg0, %c0_i32 : i32, i32
  }
  func.func @transform_1(%arg0: i32) -> (i32, i32) {
    %c0_i32 = arith.constant 0 : i32
    %c0_i32_0 = arith.constant 0 : i32
    %c0_i32_1 = arith.constant 0 : i32
    return %c0_i32, %c0_i32_0 : i32, i32
  }
  func.func @transform_2(%arg0: i32) -> (i32, i32) {
    %c0_i32 = arith.constant 0 : i32
    %c0_i32_0 = arith.constant 0 : i32
    %c0_i32_1 = arith.constant 0 : i32
    return %c0_i32, %c0_i32_0 : i32, i32
  }
  func.func @transform_3(%arg0: i32) -> (i32, i32) {
    %c0_i32 = arith.constant 0 : i32
    %c0_i32_0 = arith.constant 0 : i32
    %c0_i32_1 = arith.constant 0 : i32
    return %c0_i32, %c0_i32_0 : i32, i32
  }
  func.func @transform_4(%arg0: i32) -> (i32, i32) {
    %c0_i32 = arith.constant 0 : i32
    %c0_i32_0 = arith.constant 0 : i32
    %c0_i32_1 = arith.constant 0 : i32
    return %c0_i32, %c0_i32_0 : i32, i32
  }
  func.func @transform_5(%arg0: i32) -> (i32, i32) {
    %c0_i32 = arith.constant 0 : i32
    %c0_i32_0 = arith.constant 0 : i32
    %c0_i32_1 = arith.constant 0 : i32
    return %c0_i32, %c0_i32_0 : i32, i32
  }
  func.func @transform_6(%arg0: i32) -> (i32, i32) {
    %c0_i32 = arith.constant 0 : i32
    %c0_i32_0 = arith.constant 0 : i32
    %c0_i32_1 = arith.constant 0 : i32
    return %c0_i32, %c0_i32_0 : i32, i32
  }
  func.func @transform_7(%arg0: i32) -> (i32, i32) {
    %c0_i32 = arith.constant 0 : i32
    %c0_i32_0 = arith.constant 0 : i32
    return %arg0, %c0_i32 : i32, i32
  }
}

</mosaic_0001>

<bundles_post_ra>
// kernel: neural_network_forward.1
= control target key start
LH: loop header
LB: loop body
LE: loop exit
PB: predicated region body
PF: predicated region fallthrough
CT: control target
= control target key end

     0   :  { %v475_v1 = vmov 0.0   ;;  %vm476_vm0 = vmmov 0   ;;  %vm87_vm1 = vcmask 261120   ;;  %s620_s0 = inlined_call_operand.vmem [shape: f32[8,32], index: 0, kind: input, shape index: {}]   ;;  %s621_s1 = inlined_call_operand.vmem [shape: bf16[32,128], index: 1, kind: input, shape index: {}]   ;;  %s622_s2 = inlined_call_operand.vmem [shape: f32[1,128], index: 2, kind: input, shape index: {}]   ;;  %s623_s3 = inlined_call_operand.vmem [shape: bf16[128,128], index: 3, kind: input, shape index: {}]   ;;  %s624_s4 = inlined_call_operand.vmem [shape: f32[1,128], index: 4, kind: input, shape index: {}]   ;;  %s625_s5 = inlined_call_operand.vmem [shape: bf16[128,8], index: 5, kind: input, shape index: {}]   ;;  %s626_s6 = inlined_call_operand.vmem [shape: f32[1,8], index: 6, kind: input, shape index: {}]   ;;  %s627_s7 = inlined_call_operand.hbm [shape: f32[8,8], index: 7, kind: output, shape index: {}]  }
   0x1   :  { %v433_v0 = vld [vmem:[%s621_s1] sm:$0xff]   ;;  %382 = vmatprep.subr.bf16.mxu0 %v475_v1  ;;  %v434_v2 = vld [vmem:[%s621_s1 + $0x8] sm:$0xff]   ;;  %390 = vmatprep.subr.bf16.mxu1 %v475_v1  ;;  %v437_v7 = vld [vmem:[%s623_s3 + $0x10] sm:$0xff]  }
   0x2   :  { %383 = vmatpush3.bf16.msra.mxu0 %v433_v0  ;;  %386 = vmatprep.mubr.msk.bf16.mxu0 %vm476_vm0, %v475_v1  ;;  %v67_v3 = vld [vmem:[%s620_s0] sm:$0xff]  ;;  %v436_v6 = vld [vmem:[%s623_s3 + $0x8] sm:$0xff]   ;;  %v438_v8 = vld [vmem:[%s623_s3 + $0x18] sm:$0xff]  }
   0x3   :  { %384 = vmatprep.subr.bf16.mxu0 %v475_v1  ;;  %v435_v4 = vld [vmem:[%s623_s3] sm:$0xff]   ;;  %406 = vmatprep.mubr.msk.bf16.mxu1 %vm476_vm0, %v475_v1  ;;  %v68_v5 = vpack.c.bf16 %v67_v3, %v67_v3 }
   0x4   :  { %391 = vmatpush3.bf16.msra.mxu1 %v435_v4 }
   0x5   :  { %392 = vmatprep.subr.bf16.mxu1 %v475_v1 }
   0x6   :  { %385 = vmatpush3.bf16.msra.mxu0 %v434_v2 }
   0x7   :  { %410 = vmatprep.subr.bf16.mxu0 %v475_v1 }
   0x8   :  { %393 = vmatpush3.bf16.msra.mxu1 %v436_v6 }
   0x9   :  { %387 = vmatmul.mubr.msk.bf16.vlgmr.msra.gmra.mrb[0].mxu0 %vm87_vm1, %v68_v5  ;;  %394 = vmatprep.subr.bf16.mxu1 %v475_v1 }
   0xa   :  { %426 = vmatprep.mubr.msk.bf16.mxu0 %vm476_vm0, %v475_v1 }
   0xc   :  { %395 = vmatpush3.bf16.msra.mxu1 %v437_v7 }
   0xd   :  { %396 = vmatprep.subr.bf16.mxu1 %v475_v1 }
   0xe   :  { %12 = vsyncpa [#allocation3], 0  ;;  %v439_v9 = vld [vmem:[%s623_s3 + $0x20] sm:$0xff]   ;;  %v440_v10 = vld [vmem:[%s623_s3 + $0x28] sm:$0xff]   ;;  %s477_s16 = smov [#allocation2]   ;;  %vm323_vm2 = vcmask 64512  }
   0xf   :  { %v441_v11 = vld [vmem:[%s623_s3 + $0x30] sm:$0xff]   ;;  %v442_v12 = vld [vmem:[%s623_s3 + $0x38] sm:$0xff]   ;;  %v443_v13 = vld [vmem:[%s625_s5] sm:$0xff]   ;;  %s331_s17 = sshll.u32 %s477_s16, 4  ;;  %s332_s17 = int_to_ptr.vmem [resolvable:$true] %s331_s17 }
  0x10   :  { %397 = vmatpush3.bf16.msra.mxu1 %v438_v8  ;;  %411 = vmatpush3.bf16.msra.mxu0 %v443_v13  ;;  %v444_v14 = vld [vmem:[%s625_s5 + $0x8] sm:$0xff]   ;;  %v445_v15 = vld [vmem:[%s625_s5 + $0x10] sm:$0xff]   ;;  %v446_v16 = vld [vmem:[%s625_s5 + $0x18] sm:$0xff]   ;;  %p456_p1 = scmp.lt.s32.totalorder %s332_s17, %s332_s17 }
  0x11   :  { %398 = vmatprep.subr.bf16.mxu1 %v475_v1  ;;  %412 = vmatprep.subr.bf16.mxu0 %v475_v1  ;;  %v447_v17 = vld [vmem:[%s625_s5 + $0x20] sm:$0xff]   ;;  %v448_v18 = vld [vmem:[%s625_s5 + $0x28] sm:$0xff]   ;;  %v449_v27 = vld [vmem:[%s625_s5 + $0x30] sm:$0xff]  }
  0x12   :  { %v339_v19 = vld [vmem:[%s622_s2] ss:$0 sm:$0xff]  ;;  %v450_v28 = vld [vmem:[%s625_s5 + $0x38] sm:$0xff]  }
  0x13   :  { %v343_v29 = vld [vmem:[%s624_s4] ss:$0 sm:$0xff]  ;;  %s451_s4 = scalar_lea.vmem %s332_s17, 128 }
  0x14   :  { %399 = vmatpush3.bf16.msra.mxu1 %v439_v9  ;;  %413 = vmatpush3.bf16.msra.mxu0 %v444_v14  ;;  %v352_v37 = vld [vmem:[%s626_s6] ss:$0 sm:$0xff]  ;;  %p452_p0 = scmp.ne.s32.totalorder %s332_s17, %s451_s4  ;;  %p457_p2 = scmp.lt.s32.totalorder %s451_s4, %s451_s4 }
  0x15   :  { %400 = vmatprep.subr.bf16.mxu1 %v475_v1  ;;  %414 = vmatprep.subr.bf16.mxu0 %v475_v1 }
  0x16   :  { %p458_p3 = por %p457_p2, %p456_p1 }
  0x18   :  { %401 = vmatpush3.bf16.msra.mxu1 %v440_v10  ;;  %415 = vmatpush3.bf16.msra.mxu0 %v445_v15  ;;  %p459_p4 = pnand %p458_p3, %p452_p0 }
  0x19   :  { %402 = vmatprep.subr.bf16.mxu1 %v475_v1  ;;  %416 = vmatprep.subr.bf16.mxu0 %v475_v1 }
  0x1c   :  { %403 = vmatpush3.bf16.msra.mxu1 %v441_v11  ;;  %417 = vmatpush3.bf16.msra.mxu0 %v446_v16 }
  0x1d   :  { %404 = vmatprep.subr.bf16.mxu1 %v475_v1  ;;  %418 = vmatprep.subr.bf16.mxu0 %v475_v1 }
  0x20   :  { %405 = vmatpush3.bf16.msra.mxu1 %v442_v12  ;;  %419 = vmatpush3.bf16.msra.mxu0 %v447_v17 }
  0x21   :  { %420 = vmatprep.subr.bf16.mxu0 %v475_v1 }
  0x24   :  { %421 = vmatpush3.bf16.msra.mxu0 %v448_v18 }
  0x25   :  { %422 = vmatprep.subr.bf16.mxu0 %v475_v1 }
  0x28   :  { %423 = vmatpush3.bf16.msra.mxu0 %v449_v27 }
  0x29   :  { %424 = vmatprep.subr.bf16.mxu0 %v475_v1 }
  0x2c   :  { %425 = vmatpush3.bf16.msra.mxu0 %v450_v28 }
  0xdc   :  { %v125_v20 = vpop.f32.mrb[0].mxu0 }
  0xdd   :  { %v126_v21 = vadd.f32 %v339_v19, %v125_v20  ;;  %v388_v22 = vpop.f32.mrb[1].mxu0 }
  0xde   :  { %v128_v23 = vpop.f32.mrb[2].mxu0 }
  0xdf   :  { %v131_v24 = vmax.f32 %v126_v21, 0.0  ;;  %v389_v25 = vpop.f32.mrb[3].mxu0 }
  0xe1   :  { %v132_v26 = vpack.c.bf16 %v131_v24, %v131_v24 }
  0xe3   :  { %407 = vmatmul.mubr.bf16.vlgmr.msra.gmra.mrb[0].mxu1 %v132_v26 }
 0x1b6   :  { %v221_v30 = vpop.f32.mrb[0].mxu1 }
 0x1b7   :  { %v222_v31 = vadd.f32 %v343_v29, %v221_v30  ;;  %v408_v32 = vpop.f32.mrb[1].mxu1 }
 0x1b8   :  { %v224_v33 = vpop.f32.mrb[2].mxu1 }
 0x1b9   :  { %v227_v34 = vmax.f32 %v222_v31, 0.0  ;;  %v409_v35 = vpop.f32.mrb[3].mxu1 }
 0x1bb   :  { %v228_v36 = vpack.c.bf16 %v227_v34, %v227_v34 }
 0x1bd   :  { %427 = vmatmul.mubr.bf16.vlgmr.msra.gmra.mrb[4].mxu0 %v228_v36 }
 0x290   :  { %v317_v38 = vpop.f32.mrb[4].mxu0 }
 0x291   :  { %v318_v39 = vadd.f32 %v352_v37, %v317_v38  ;;  %v428_v40 = vpop.f32.mrb[5].mxu0 }
 0x292   :  { %v320_v41 = vpop.f32.mrb[6].mxu0 }
 0x293   :  { %v429_v42 = vpop.f32.mrb[7].mxu0  ;;  %324 = vst.msk [vmem:[#allocation2] sm:$0xff] %vm323_vm2, %v318_v39 }
 0x294   :  { %462 = shalt.err (!%p459_p4)
}
 0x295   :  { %s463_s6 = scalar_lea.hbm %s627_s7, 128 }
 0x296   :  { %p464_p5 = scmp.ne.s32.totalorder %s627_s7, %s463_s6  ;;  %p467_p6 = scmp.lt.u32.totalorder %s463_s6, %s627_s7 }
 0x298   :  { %p469_p7 = pnand %p467_p6, %p464_p5 }
 0x29a   :  { %472 = shalt.err (!%p469_p7)
}
 0x29b   :  { %334 = dma.vmem_to_hbm [thread:$0]  %s332_s17, 128, %s627_s7, [#allocation3]  }
 0x29c   :  { %473 = dma.done.wait [#allocation3], 128  }
 0x29d   :  { %474 = vsyncadd [#allocation3], 4294967168 }
 0x29e   :  { %338 = vsyncpa [#allocation3], 1 }

</bundles_post_ra>
